<compile_context>
chip_gen: v6e
topology: v6e:2x2x1
jax: 0.10.0
libtpu: 0.0.40
codegen_flags: <defaults>
</compile_context>

<pallas_src>
import jax
import jax.numpy as jnp
from jax.experimental import pallas as pl
from jax.experimental.pallas import tpu as pltpu


def _pair(v):
    if isinstance(v, (tuple, list)):
        assert len(v) == 2
        return (int(v[0]), int(v[1]))
    return (int(v), int(v))


def _round_up(a, b):
    return (a + b - 1) // b * b


def _tile_bytes(rows, cols, itemsize):
    """VMEM bytes of a (rows, cols) slab after (sublane, 128) tile padding."""
    sub = max(8, 32 // itemsize)
    return _round_up(rows, sub) * _round_up(cols, 128) * itemsize


def _pick_rows_per_step(n_h, slab_bytes, budget_bytes=2 << 20, max_rows=8):
    """Largest divisor of n_h (<= max_rows) whose double-buffered output block
    stays under budget: amortizes the ~0.35us per-grid-step overhead without
    creating a huge unrolled kernel body."""
    best = 1
    for d in range(1, min(n_h, max_rows) + 1):
        if n_h % d == 0 and 2 * d * slab_bytes <= budget_bytes:
            best = d
    return best


def extract_tensor_patches(x, window_size, stride=1, padding=0):
    """Pallas TPU implementation of kornia.contrib.extract_tensor_patches."""
    if x.ndim != 4:
        raise ValueError(f"Invalid input shape, expected BxCxHxW, got {x.shape}")
    wh, ww = _pair(window_size)
    sh, sw = _pair(stride)
    ph, pw = _pair(padding)

    B, C, H, W = x.shape
    Hp, Wp = H + 2 * ph, W + 2 * pw
    n_h = (Hp - wh) // sh + 1
    n_w = (Wp - ww) // sw + 1
    N = n_h * n_w
    Ncols = n_w * ww                       # lane-dense gathered width per window row
    itemsize = jnp.dtype(x.dtype).itemsize

    use_mxu = jnp.issubdtype(x.dtype, jnp.floating)
    if x.dtype in (jnp.dtype(jnp.float32), jnp.dtype(jnp.bfloat16)):
        mm_dtype = x.dtype
    else:
        mm_dtype = jnp.float32

    # ---- wrapper-side prep ---------------------------------------------------
    if use_mxu:
        # Pad only vertically (tiny); horizontal padding lives in G's zero cols.
        xin = jnp.pad(x, ((0, 0), (0, 0), (ph, ph), (0, 0))) if ph else x
        Wk = W
        q = jnp.arange(Ncols)
        src = (q // ww) * sw + (q % ww) - pw           # source col in unpadded coords
        valid = (src >= 0) & (src < W)
        g_mat = ((jnp.arange(W)[:, None] == src[None, :]) & valid[None, :]).astype(mm_dtype)
    else:
        # Copy-based fallback for integer dtypes (v7x MXU has no int path).
        xin = jnp.pad(x, ((0, 0), (0, 0), (ph, ph), (pw, pw))) if (ph or pw) else x
        Wk = Wp
        g_mat = None

    Hin = xin.shape[2]
    slab_bytes = _tile_bytes(C * wh, Ncols, itemsize)
    R = _pick_rows_per_step(n_h, slab_bytes)
    n_groups = n_h // R

    # ---- kernels ---------------------------------------------------------------
    def kernel_mxu(x_ref, g_ref, o_ref):
        # x_ref: (1, C, Hin, W)   g_ref: (W, Ncols)   o_ref: (1, R, C*wh, Ncols)
        grp = pl.program_id(1)
        g = g_ref[...]
        for rr in range(R):                                # bounded static unroll (R <= 8)
            row0 = (grp * R + rr) * sh
            band = x_ref[0, :, pl.ds(row0, wh), :]         # (C, wh, W): natural (H, W) slice
            band = band.reshape(C * wh, Wk).astype(mm_dtype)
            patches = jnp.dot(band, g, preferred_element_type=jnp.float32)
            o_ref[0, rr] = patches.astype(o_ref.dtype)     # one wide (C*wh, Ncols) store

    def kernel_copy(x_ref, o_ref):
        # x_ref: (1, C, Hin, Wp)   o_ref: (1, R, C*wh, Ncols)
        grp = pl.program_id(1)
        for rr in range(R):
            row0 = (grp * R + rr) * sh
            band = x_ref[0, :, pl.ds(row0, wh), :]         # (C, wh, Wp)
            pieces = [band[:, :, j * sw:j * sw + ww] for j in range(n_w)]
            o_ref[0, rr] = jnp.concatenate(pieces, axis=-1).reshape(C * wh, Ncols)

    x_spec = pl.BlockSpec((1, C, Hin, Wk), lambda b, gidx: (b, 0, 0, 0))
    out_spec = pl.BlockSpec((1, R, C * wh, Ncols), lambda b, gidx: (b, gidx, 0, 0))

    if use_mxu:
        in_specs = [x_spec, pl.BlockSpec((Wk, Ncols), lambda b, gidx: (0, 0))]
        operands = (xin, g_mat)
        kernel = kernel_mxu
        flops = 2 * B * n_h * (C * wh) * Wk * Ncols
    else:
        in_specs = [x_spec]
        operands = (xin,)
        kernel = kernel_copy
        flops = 0

    # VMEM accounting: double-buffered blocks with (sublane, 128) tile padding;
    # cap at 48 MiB so the limit is also legal on v7x (64 MiB physical).
    need = 2 * C * _tile_bytes(Hin, Wk, itemsize)                       # input block x2
    need += 2 * R * slab_bytes                                          # output block x2
    if use_mxu:
        need += 2 * _tile_bytes(Wk, Ncols, jnp.dtype(mm_dtype).itemsize)
    need += 4 << 20                                                     # compiler scratch margin
    vmem_limit = int(min(max(need, 32 << 20), 48 << 20))
    # TODO(synk): for very large images, tile the input block over H (one band per
    # group) instead of keeping the whole frame resident, to fit v7x's 64 MiB VMEM.

    bytes_accessed = (int(xin.size) + B * n_h * C * wh * Ncols) * itemsize

    out4 = pl.pallas_call(
        kernel,
        out_shape=jax.ShapeDtypeStruct((B, n_h, C * wh, Ncols), x.dtype),
        grid=(B, n_groups),
        in_specs=in_specs,
        out_specs=out_spec,
        compiler_params=pltpu.CompilerParams(
            dimension_semantics=("parallel", "parallel"),
            vmem_limit_bytes=vmem_limit,
        ),
        cost_estimate=pl.CostEstimate(
            flops=int(flops), transcendentals=0, bytes_accessed=int(bytes_accessed)),
    )(*operands)

    # Layout plumbing back to kornia's (B, N, C, wh, ww).
    out = out4.reshape(B, n_h, C, wh, n_w, ww)
    out = jnp.transpose(out, (0, 1, 4, 2, 3, 5))      # (B, n_h, n_w, C, wh, ww)
    return out.reshape(B, N, C, wh, ww)


class ExtractTensorPatches:
    """Mirror of the PyTorch module (no learnable parameters)."""

    def __init__(self, window_size, stride=1, padding=0):
        self.window_size = _pair(window_size)
        self.stride = _pair(stride)
        self.padding = _pair(padding)

    def __call__(self, x):
        return extract_tensor_patches(x, self.window_size, self.stride, self.padding)


def _reference(x, window_size, stride, padding):
    """Pure-JAX reference replicating torch unfold/permute/view semantics."""
    wh, ww = window_size
    sh, sw = stride
    ph, pw = padding
    xp = jnp.pad(x, ((0, 0), (0, 0), (ph, ph), (pw, pw)))
    B, C, Hp, Wp = xp.shape
    n_h = (Hp - wh) // sh + 1
    n_w = (Wp - ww) // sw + 1
    patches = []
    for i in range(n_h):
        for j in range(n_w):
            patches.append(xp[:, :, i * sh:i * sh + wh, j * sw:j * sw + ww])
    return jnp.stack(patches, axis=1)  # (B, N, C, wh, ww)


if __name__ == "__main__":
    key = jax.random.PRNGKey(0)
    B, C, H, W = 2, 4, 16, 16
    x = jax.random.normal(key, (B, C, H, W), dtype=jnp.float32)

    # Case 1: square window, stride 2, padding 1 (padding folded into G / wrapper H-pad).
    m1 = ExtractTensorPatches(4, stride=2, padding=1)
    out1 = jax.block_until_ready(m1(x))
    ref1 = _reference(x, (4, 4), (2, 2), (1, 1))
    n_h1 = (H + 2 - 4) // 2 + 1
    n_w1 = (W + 2 - 4) // 2 + 1
    assert out1.shape == (B, n_h1 * n_w1, C, 4, 4), out1.shape
    assert out1.dtype == x.dtype
    assert jnp.array_equal(out1, ref1), "Pallas output mismatch vs reference (case 1)"

    # Case 2: asymmetric window, no padding.
    m2 = ExtractTensorPatches((2, 4), stride=(2, 2), padding=0)
    out2 = jax.block_until_ready(m2(x))
    ref2 = _reference(x, (2, 4), (2, 2), (0, 0))
    assert out2.shape == ref2.shape, (out2.shape, ref2.shape)
    assert jnp.array_equal(out2, ref2), "Pallas output mismatch vs reference (case 2)"

    print("KERNEL_OK")
</pallas_src>

<mosaic_0001>
module attributes {stable_mosaic.version = 11 : i64} {
  func.func @kernel_mxu(%arg0: i32, %arg1: i32, %arg2: memref<1x4x18x16xf32, #tpu.memory_space<vmem>>, %arg3: memref<16x32xf32, #tpu.memory_space<vmem>>, %arg4: memref<1x8x16x32xf32, #tpu.memory_space<vmem>>) attributes {dimension_semantics = [#tpu.dimension_semantics<parallel>, #tpu.dimension_semantics<parallel>], iteration_bounds = array<i64: 2, 1>, scalar_prefetch = 0 : i64, scratch_operands = 0 : i64, tpu.core_type = #tpu.core_type<tc>, window_params = [{transform_indices = @transform_0, window_bounds = array<i64: 1, 4, 18, 16>}, {pipeline_mode = #tpu.pipeline_mode<synchronous>, transform_indices = @transform_1, window_bounds = array<i64: 16, 32>}, {transform_indices = @transform_2, window_bounds = array<i64: 1, 8, 16, 32>}]} {
    %c0 = arith.constant 0 : index
    %c0_0 = arith.constant 0 : index
    %0 = vector.load %arg3[%c0, %c0_0] : memref<16x32xf32, #tpu.memory_space<vmem>>, vector<16x32xf32>
    %c8_i32 = arith.constant 8 : i32
    %1 = arith.muli %arg1, %c8_i32 : i32
    %c0_i32 = arith.constant 0 : i32
    %2 = arith.addi %1, %c0_i32 : i32
    %c2_i32 = arith.constant 2 : i32
    %3 = arith.muli %2, %c2_i32 : i32
    %c0_1 = arith.constant 0 : index
    %c0_2 = arith.constant 0 : index
    %4 = arith.index_cast %3 : i32 to index
    %c0_3 = arith.constant 0 : index
    %5 = vector.load %arg2[%c0_1, %c0_2, %4, %c0_3] : memref<1x4x18x16xf32, #tpu.memory_space<vmem>>, vector<1x4x4x16xf32>
    %6 = vector.shape_cast %5 : vector<1x4x4x16xf32> to vector<4x4x16xf32>
    %7 = vector.shape_cast %6 : vector<4x4x16xf32> to vector<16x16xf32>
    %cst = arith.constant dense<0.000000e+00> : vector<16x32xf32>
    %8 = tpu.matmul %7, %0, %cst {dimension_numbers = #tpu.dot_dimension_numbers<[1], [0], [0], [1], [0, 0, 1, 1], [], []>} : vector<16x16xf32>, vector<16x32xf32>, vector<16x32xf32> -> vector<16x32xf32>
    %c0_4 = arith.constant 0 : index
    %c0_5 = arith.constant 0 : index
    %c0_6 = arith.constant 0 : index
    %c0_7 = arith.constant 0 : index
    %9 = vector.load %arg4[%c0_4, %c0_5, %c0_6, %c0_7] : memref<1x8x16x32xf32, #tpu.memory_space<vmem>>, vector<1x1x16x32xf32>
    %10 = vector.shape_cast %9 : vector<1x1x16x32xf32> to vector<16x32xf32>
    %11 = vector.shape_cast %8 : vector<16x32xf32> to vector<1x1x16x32xf32>
    tpu.vector_store %arg4[%c0_4, %c0_5, %c0_6, %c0_7], %11 {strides = array<i32>} : memref<1x8x16x32xf32, #tpu.memory_space<vmem>>, vector<1x1x16x32xf32>,
    %c8_i32_8 = arith.constant 8 : i32
    %12 = arith.muli %arg1, %c8_i32_8 : i32
    %c1_i32 = arith.constant 1 : i32
    %13 = arith.addi %12, %c1_i32 : i32
    %c2_i32_9 = arith.constant 2 : i32
    %14 = arith.muli %13, %c2_i32_9 : i32
    %c0_10 = arith.constant 0 : index
    %c0_11 = arith.constant 0 : index
    %15 = arith.index_cast %14 : i32 to index
    %c0_12 = arith.constant 0 : index
    %16 = vector.load %arg2[%c0_10, %c0_11, %15, %c0_12] : memref<1x4x18x16xf32, #tpu.memory_space<vmem>>, vector<1x4x4x16xf32>
    %17 = vector.shape_cast %16 : vector<1x4x4x16xf32> to vector<4x4x16xf32>
    %18 = vector.shape_cast %17 : vector<4x4x16xf32> to vector<16x16xf32>
    %cst_13 = arith.constant dense<0.000000e+00> : vector<16x32xf32>
    %19 = tpu.matmul %18, %0, %cst_13 {dimension_numbers = #tpu.dot_dimension_numbers<[1], [0], [0], [1], [0, 0, 1, 1], [], []>} : vector<16x16xf32>, vector<16x32xf32>, vector<16x32xf32> -> vector<16x32xf32>
    %c0_14 = arith.constant 0 : index
    %c1 = arith.constant 1 : index
    %c0_15 = arith.constant 0 : index
    %c0_16 = arith.constant 0 : index
    %20 = vector.load %arg4[%c0_14, %c1, %c0_15, %c0_16] : memref<1x8x16x32xf32, #tpu.memory_space<vmem>>, vector<1x1x16x32xf32>
    %21 = vector.shape_cast %20 : vector<1x1x16x32xf32> to vector<16x32xf32>
    %22 = vector.shape_cast %19 : vector<16x32xf32> to vector<1x1x16x32xf32>
    tpu.vector_store %arg4[%c0_14, %c1, %c0_15, %c0_16], %22 {strides = array<i32>} : memref<1x8x16x32xf32, #tpu.memory_space<vmem>>, vector<1x1x16x32xf32>,
    %c8_i32_17 = arith.constant 8 : i32
    %23 = arith.muli %arg1, %c8_i32_17 : i32
    %c2_i32_18 = arith.constant 2 : i32
    %24 = arith.addi %23, %c2_i32_18 : i32
    %c2_i32_19 = arith.constant 2 : i32
    %25 = arith.muli %24, %c2_i32_19 : i32
    %c0_20 = arith.constant 0 : index
    %c0_21 = arith.constant 0 : index
    %26 = arith.index_cast %25 : i32 to index
    %c0_22 = arith.constant 0 : index
    %27 = vector.load %arg2[%c0_20, %c0_21, %26, %c0_22] : memref<1x4x18x16xf32, #tpu.memory_space<vmem>>, vector<1x4x4x16xf32>
    %28 = vector.shape_cast %27 : vector<1x4x4x16xf32> to vector<4x4x16xf32>
    %29 = vector.shape_cast %28 : vector<4x4x16xf32> to vector<16x16xf32>
    %cst_23 = arith.constant dense<0.000000e+00> : vector<16x32xf32>
    %30 = tpu.matmul %29, %0, %cst_23 {dimension_numbers = #tpu.dot_dimension_numbers<[1], [0], [0], [1], [0, 0, 1, 1], [], []>} : vector<16x16xf32>, vector<16x32xf32>, vector<16x32xf32> -> vector<16x32xf32>
    %c0_24 = arith.constant 0 : index
    %c2 = arith.constant 2 : index
    %c0_25 = arith.constant 0 : index
    %c0_26 = arith.constant 0 : index
    %31 = vector.load %arg4[%c0_24, %c2, %c0_25, %c0_26] : memref<1x8x16x32xf32, #tpu.memory_space<vmem>>, vector<1x1x16x32xf32>
    %32 = vector.shape_cast %31 : vector<1x1x16x32xf32> to vector<16x32xf32>
    %33 = vector.shape_cast %30 : vector<16x32xf32> to vector<1x1x16x32xf32>
    tpu.vector_store %arg4[%c0_24, %c2, %c0_25, %c0_26], %33 {strides = array<i32>} : memref<1x8x16x32xf32, #tpu.memory_space<vmem>>, vector<1x1x16x32xf32>,
    %c8_i32_27 = arith.constant 8 : i32
    %34 = arith.muli %arg1, %c8_i32_27 : i32
    %c3_i32 = arith.constant 3 : i32
    %35 = arith.addi %34, %c3_i32 : i32
    %c2_i32_28 = arith.constant 2 : i32
    %36 = arith.muli %35, %c2_i32_28 : i32
    %c0_29 = arith.constant 0 : index
    %c0_30 = arith.constant 0 : index
    %37 = arith.index_cast %36 : i32 to index
    %c0_31 = arith.constant 0 : index
    %38 = vector.load %arg2[%c0_29, %c0_30, %37, %c0_31] : memref<1x4x18x16xf32, #tpu.memory_space<vmem>>, vector<1x4x4x16xf32>
    %39 = vector.shape_cast %38 : vector<1x4x4x16xf32> to vector<4x4x16xf32>
    %40 = vector.shape_cast %39 : vector<4x4x16xf32> to vector<16x16xf32>
    %cst_32 = arith.constant dense<0.000000e+00> : vector<16x32xf32>
    %41 = tpu.matmul %40, %0, %cst_32 {dimension_numbers = #tpu.dot_dimension_numbers<[1], [0], [0], [1], [0, 0, 1, 1], [], []>} : vector<16x16xf32>, vector<16x32xf32>, vector<16x32xf32> -> vector<16x32xf32>
    %c0_33 = arith.constant 0 : index
    %c3 = arith.constant 3 : index
    %c0_34 = arith.constant 0 : index
    %c0_35 = arith.constant 0 : index
    %42 = vector.load %arg4[%c0_33, %c3, %c0_34, %c0_35] : memref<1x8x16x32xf32, #tpu.memory_space<vmem>>, vector<1x1x16x32xf32>
    %43 = vector.shape_cast %42 : vector<1x1x16x32xf32> to vector<16x32xf32>
    %44 = vector.shape_cast %41 : vector<16x32xf32> to vector<1x1x16x32xf32>
    tpu.vector_store %arg4[%c0_33, %c3, %c0_34, %c0_35], %44 {strides = array<i32>} : memref<1x8x16x32xf32, #tpu.memory_space<vmem>>, vector<1x1x16x32xf32>,
    %c8_i32_36 = arith.constant 8 : i32
    %45 = arith.muli %arg1, %c8_i32_36 : i32
    %c4_i32 = arith.constant 4 : i32
    %46 = arith.addi %45, %c4_i32 : i32
    %c2_i32_37 = arith.constant 2 : i32
    %47 = arith.muli %46, %c2_i32_37 : i32
    %c0_38 = arith.constant 0 : index
    %c0_39 = arith.constant 0 : index
    %48 = arith.index_cast %47 : i32 to index
    %c0_40 = arith.constant 0 : index
    %49 = vector.load %arg2[%c0_38, %c0_39, %48, %c0_40] : memref<1x4x18x16xf32, #tpu.memory_space<vmem>>, vector<1x4x4x16xf32>
    %50 = vector.shape_cast %49 : vector<1x4x4x16xf32> to vector<4x4x16xf32>
    %51 = vector.shape_cast %50 : vector<4x4x16xf32> to vector<16x16xf32>
    %cst_41 = arith.constant dense<0.000000e+00> : vector<16x32xf32>
    %52 = tpu.matmul %51, %0, %cst_41 {dimension_numbers = #tpu.dot_dimension_numbers<[1], [0], [0], [1], [0, 0, 1, 1], [], []>} : vector<16x16xf32>, vector<16x32xf32>, vector<16x32xf32> -> vector<16x32xf32>
    %c0_42 = arith.constant 0 : index
    %c4 = arith.constant 4 : index
    %c0_43 = arith.constant 0 : index
    %c0_44 = arith.constant 0 : index
    %53 = vector.load %arg4[%c0_42, %c4, %c0_43, %c0_44] : memref<1x8x16x32xf32, #tpu.memory_space<vmem>>, vector<1x1x16x32xf32>
    %54 = vector.shape_cast %53 : vector<1x1x16x32xf32> to vector<16x32xf32>
    %55 = vector.shape_cast %52 : vector<16x32xf32> to vector<1x1x16x32xf32>
    tpu.vector_store %arg4[%c0_42, %c4, %c0_43, %c0_44], %55 {strides = array<i32>} : memref<1x8x16x32xf32, #tpu.memory_space<vmem>>, vector<1x1x16x32xf32>,
    %c8_i32_45 = arith.constant 8 : i32
    %56 = arith.muli %arg1, %c8_i32_45 : i32
    %c5_i32 = arith.constant 5 : i32
    %57 = arith.addi %56, %c5_i32 : i32
    %c2_i32_46 = arith.constant 2 : i32
    %58 = arith.muli %57, %c2_i32_46 : i32
    %c0_47 = arith.constant 0 : index
    %c0_48 = arith.constant 0 : index
    %59 = arith.index_cast %58 : i32 to index
    %c0_49 = arith.constant 0 : index
    %60 = vector.load %arg2[%c0_47, %c0_48, %59, %c0_49] : memref<1x4x18x16xf32, #tpu.memory_space<vmem>>, vector<1x4x4x16xf32>
    %61 = vector.shape_cast %60 : vector<1x4x4x16xf32> to vector<4x4x16xf32>
    %62 = vector.shape_cast %61 : vector<4x4x16xf32> to vector<16x16xf32>
    %cst_50 = arith.constant dense<0.000000e+00> : vector<16x32xf32>
    %63 = tpu.matmul %62, %0, %cst_50 {dimension_numbers = #tpu.dot_dimension_numbers<[1], [0], [0], [1], [0, 0, 1, 1], [], []>} : vector<16x16xf32>, vector<16x32xf32>, vector<16x32xf32> -> vector<16x32xf32>
    %c0_51 = arith.constant 0 : index
    %c5 = arith.constant 5 : index
    %c0_52 = arith.constant 0 : index
    %c0_53 = arith.constant 0 : index
    %64 = vector.load %arg4[%c0_51, %c5, %c0_52, %c0_53] : memref<1x8x16x32xf32, #tpu.memory_space<vmem>>, vector<1x1x16x32xf32>
    %65 = vector.shape_cast %64 : vector<1x1x16x32xf32> to vector<16x32xf32>
    %66 = vector.shape_cast %63 : vector<16x32xf32> to vector<1x1x16x32xf32>
    tpu.vector_store %arg4[%c0_51, %c5, %c0_52, %c0_53], %66 {strides = array<i32>} : memref<1x8x16x32xf32, #tpu.memory_space<vmem>>, vector<1x1x16x32xf32>,
    %c8_i32_54 = arith.constant 8 : i32
    %67 = arith.muli %arg1, %c8_i32_54 : i32
    %c6_i32 = arith.constant 6 : i32
    %68 = arith.addi %67, %c6_i32 : i32
    %c2_i32_55 = arith.constant 2 : i32
    %69 = arith.muli %68, %c2_i32_55 : i32
    %c0_56 = arith.constant 0 : index
    %c0_57 = arith.constant 0 : index
    %70 = arith.index_cast %69 : i32 to index
    %c0_58 = arith.constant 0 : index
    %71 = vector.load %arg2[%c0_56, %c0_57, %70, %c0_58] : memref<1x4x18x16xf32, #tpu.memory_space<vmem>>, vector<1x4x4x16xf32>
    %72 = vector.shape_cast %71 : vector<1x4x4x16xf32> to vector<4x4x16xf32>
    %73 = vector.shape_cast %72 : vector<4x4x16xf32> to vector<16x16xf32>
    %cst_59 = arith.constant dense<0.000000e+00> : vector<16x32xf32>
    %74 = tpu.matmul %73, %0, %cst_59 {dimension_numbers = #tpu.dot_dimension_numbers<[1], [0], [0], [1], [0, 0, 1, 1], [], []>} : vector<16x16xf32>, vector<16x32xf32>, vector<16x32xf32> -> vector<16x32xf32>
    %c0_60 = arith.constant 0 : index
    %c6 = arith.constant 6 : index
    %c0_61 = arith.constant 0 : index
    %c0_62 = arith.constant 0 : index
    %75 = vector.load %arg4[%c0_60, %c6, %c0_61, %c0_62] : memref<1x8x16x32xf32, #tpu.memory_space<vmem>>, vector<1x1x16x32xf32>
    %76 = vector.shape_cast %75 : vector<1x1x16x32xf32> to vector<16x32xf32>
    %77 = vector.shape_cast %74 : vector<16x32xf32> to vector<1x1x16x32xf32>
    tpu.vector_store %arg4[%c0_60, %c6, %c0_61, %c0_62], %77 {strides = array<i32>} : memref<1x8x16x32xf32, #tpu.memory_space<vmem>>, vector<1x1x16x32xf32>,
    %c8_i32_63 = arith.constant 8 : i32
    %78 = arith.muli %arg1, %c8_i32_63 : i32
    %c7_i32 = arith.constant 7 : i32
    %79 = arith.addi %78, %c7_i32 : i32
    %c2_i32_64 = arith.constant 2 : i32
    %80 = arith.muli %79, %c2_i32_64 : i32
    %c0_65 = arith.constant 0 : index
    %c0_66 = arith.constant 0 : index
    %81 = arith.index_cast %80 : i32 to index
    %c0_67 = arith.constant 0 : index
    %82 = vector.load %arg2[%c0_65, %c0_66, %81, %c0_67] : memref<1x4x18x16xf32, #tpu.memory_space<vmem>>, vector<1x4x4x16xf32>
    %83 = vector.shape_cast %82 : vector<1x4x4x16xf32> to vector<4x4x16xf32>
    %84 = vector.shape_cast %83 : vector<4x4x16xf32> to vector<16x16xf32>
    %cst_68 = arith.constant dense<0.000000e+00> : vector<16x32xf32>
    %85 = tpu.matmul %84, %0, %cst_68 {dimension_numbers = #tpu.dot_dimension_numbers<[1], [0], [0], [1], [0, 0, 1, 1], [], []>} : vector<16x16xf32>, vector<16x32xf32>, vector<16x32xf32> -> vector<16x32xf32>
    %c0_69 = arith.constant 0 : index
    %c7 = arith.constant 7 : index
    %c0_70 = arith.constant 0 : index
    %c0_71 = arith.constant 0 : index
    %86 = vector.load %arg4[%c0_69, %c7, %c0_70, %c0_71] : memref<1x8x16x32xf32, #tpu.memory_space<vmem>>, vector<1x1x16x32xf32>
    %87 = vector.shape_cast %86 : vector<1x1x16x32xf32> to vector<16x32xf32>
    %88 = vector.shape_cast %85 : vector<16x32xf32> to vector<1x1x16x32xf32>
    tpu.vector_store %arg4[%c0_69, %c7, %c0_70, %c0_71], %88 {strides = array<i32>} : memref<1x8x16x32xf32, #tpu.memory_space<vmem>>, vector<1x1x16x32xf32>,
    return
  }
  func.func @transform_0(%arg0: i32, %arg1: i32) -> (i32, i32, i32, i32) {
    %c0_i32 = arith.constant 0 : i32
    %c0_i32_0 = arith.constant 0 : i32
    %c0_i32_1 = arith.constant 0 : i32
    %c0_i32_2 = arith.constant 0 : i32
    return %arg0, %c0_i32, %c0_i32_0, %c0_i32_1 : i32, i32, i32, i32
  }
  func.func @transform_1(%arg0: i32, %arg1: i32) -> (i32, i32) {
    %c0_i32 = arith.constant 0 : i32
    %c0_i32_0 = arith.constant 0 : i32
    %c0_i32_1 = arith.constant 0 : i32
    return %c0_i32, %c0_i32_0 : i32, i32
  }
  func.func @transform_2(%arg0: i32, %arg1: i32) -> (i32, i32, i32, i32) {
    %c0_i32 = arith.constant 0 : i32
    %c0_i32_0 = arith.constant 0 : i32
    %c0_i32_1 = arith.constant 0 : i32
    return %arg0, %arg1, %c0_i32, %c0_i32_0 : i32, i32, i32, i32
  }
}

</mosaic_0001>

<bundles_post_ra>
// kernel: tpu_custom_call.1
= control target key start
LH: loop header
LB: loop body
LE: loop exit
PB: predicated region body
PF: predicated region fallthrough
CT: control target
= control target key end

     0   :  { %7 = vsyncpa [#allocation3], 0  ;;  %s1580_s0 = inlined_call_operand.vmem [shape: f32[2,4,18,16], index: 0, kind: input, shape index: {}]   ;;  %s1581_s1 = inlined_call_operand.vmem [shape: f32[16,32], index: 1, kind: input, shape index: {}]   ;;  %s1582_s2 = inlined_call_operand.hbm [shape: f32[2,8,16,32], index: 2, kind: output, shape index: {}]  }
   0x1   :  { %9 = vsyncpa [#allocation3 + $0x1], 0  ;;  %s1369_s9 = smov 0   ;;  %s1371_s10 = smov 0  }
   0x2   :  { %s1373_s11 = smov 0   ;;  %s1375_s12 = smov 0  }
   0x3   :  { %s1377_s13 = smov 0   ;;  %s1379_s14 = smov 0  }
   0x4 LB: > { %s1040_s15 = sadd.s32 4294967295, %s1349_s14   ;;  %s1041_s16 = sadd.s32 4294967294, %s1349_s14   ;;  %s1349_s14 = sphi %s1379_s14, %s15_s14   ;;  %s1345_s13 = sphi %s1377_s13, %s1589_s13   ;;  %s1341_s12 = sphi %s1375_s12, %s1588_s12   ;;  %s1337_s11 = sphi %s1373_s11, %s1587_s11   ;;  %s1333_s10 = sphi %s1371_s10, %s1586_s10   ;;  %s1329_s9 = sphi %s1369_s9, %s1585_s9  }
   0x5   : > { %s27_s17 = sadd.s32 1, %s1345_s13  ;;  %s83_s18 = sadd.s32 1, %s1337_s11 }
   0x6   : > { %p29_p0 = scmp.ge.s32.totalorder %s27_s17, 2  ;;  %p93_p1 = scmp.ne.s32.totalorder %s1337_s11, %s1333_s10 }
   0x7   : > { %p94_p2 = scmp.eq.s32.totalorder %s1040_s15, 1  ;;  %p99_p3 = scmp.ne.s32.totalorder %s1333_s10, %s1329_s9 }
   0x8   : > { %s1591_s17 = smov (%p29_p0, %s27_s17), 0  ;;  %p100_p5 = scmp.eq.s32.totalorder %s1041_s16, 1 }
   0x9   : > { %p1409_p4 = por %p94_p2, %p93_p1  ;;  %s78_s20 = ssub.s32 %s1345_s13, %s1591_s17 }
   0xa   : > { %p1044_p6 = scmp.ge.s32.totalorder %s1349_s14, 1  ;;  %p81_p7 = scmp.eq.s32.totalorder %s78_s20, 0 }
   0xb   : > { %p1416_p8 = por %p100_p5, %p99_p3  ;;  %p129_p9 = scmp.lt.s32.totalorder %s1349_s14, 3 }
   0xc   : > { %s1422_s22 = scalar_select %p81_p7, %s1337_s11, %s83_s18  }
   0xd   : > { %p130_p10 = pnand %p1044_p6, %p129_p9 }
   0xe   : > { %p151_p11 = scmp.lt.s32.totalorder (!%p130_p10), %s1341_s12, 1  ;;  %s148_s4 = sand.u32 (!%p130_p10), 1, %s1333_s10  }
   0xf   : > { %133 = sbr.rel (%p130_p10) target bundleno = 254 (0xfe), region = 28  ;;  %s1045_s5 = sshll.u32 (!%p130_p10), %s148_s4, 7 }
  0x10   : > { %s1490_s6 = scalar_lea.vmem (!%p130_p10), [#allocation2], %s1045_s5  ;;  %s1110_s7 = sshll.u32 (!%p130_p10), %s1341_s12, 11 }
  0x11   : > { %s937_s8 = sshll.u32 (!%p130_p10), %s1490_s6, 4  ;;  %s1523_s18 = scalar_lea.hbm (!%p130_p10), %s1582_s2, %s1110_s7  ;;  %s1525_s8 = int_to_ptr.vmem [resolvable:$true] %s937_s8 }
  0x12   : > { %s1273_s20 = scalar_lea.vmem (!%p130_p10), %s1525_s8, 2048  ;;  %s1351_s23 = smov (!%p130_p10), [#allocation2]  }
  0x13   : > { %p1274_p12 = scmp.ne.s32.totalorder (!%p130_p10), %s1525_s8, %s1273_s20  ;;  %s1277_s24 = sshll.u32 (!%p130_p10), %s1351_s23, 4  ;;  %s1278_s24 = int_to_ptr.vmem [resolvable:$false] %s1277_s24 }
  0x14   : > { %v158_v0 = vld [vmem:[%s1581_s1 + $0x8] sm:$0xff]  ;;  %v1430_v1 = vld [vmem:[%s1581_s1] sm:$0xff]  ;;  %s152_s27 = scalar_select %p151_p11, %s1341_s12, 1  ;;  %vm171_vm0 = vcmask 130048   ;;  %vm251_vm1 = vcmask 261120  }
  0x15   : > { %1143 = vmatprep.subr.mxu0 %v158_v0  ;;  %1150 = vmatprep.subr.mxu1 %v158_v0  ;;  %s1535_s12 = scalar_lea.sflag [#allocation3], %s148_s4  ;;  %p1275_p13 = pnand %p1274_p12, %p1409_p4 }
  0x16   : > { %1144 = vmatpush3.msra.mxu0 %v158_v0  ;;  %1151 = vmatpush3.msra.mxu1 %v158_v0  ;;  %s1199_s28 = smul.u32 96, %s152_s27  ;;  %s1279_s25 = scalar_lea.vmem %s1278_s24, 4096 }
  0x17   : > { %1145 = vmatprep.subr.mxu0 %v1430_v1  ;;  %1152 = vmatprep.subr.mxu1 %v1430_v1  ;;  %p1276_p0 = pneg %p1275_p13  ;;  %p1280_p1 = scmp.lt.s32.totalorder %s1525_s8, %s1278_s24 }
  0x18   : > { %1146 = vmatpush3.msra.mxu0 %v1430_v1  ;;  %1153 = vmatpush3.msra.mxu1 %v1430_v1  ;;  %s1441_s3 = scalar_lea.vmem %s1580_s0, %s1199_s28  ;;  %p1281_p2 = scmp.lt.s32.totalorder %s1279_s25, %s1273_s20 }
  0x19   : > { %1157 = vmatprep.subr.mxu0 %v158_v0  ;;  %1164 = vmatprep.subr.mxu1 %v158_v0  ;;  %v1257_v2 = vld [vmem:[%s1441_s3] ss:$24 sps:$4 sm:$0xff]   ;;  %v1259_v4 = vld [vmem:[%s1441_s3 + $0x30] ss:$24 sps:$4 sm:$0xff]   ;;  %v1261_v6 = vld [vmem:[%s1441_s3 + $0x4] ss:$24 sps:$4 sm:$0xff]  }
  0x1a   : > { %v1258_v3 = vld [vmem:[%s1441_s3 + $0x2] ss:$24 sps:$4 sm:$0xff]   ;;  %1147 = vmatprep.mubr.msk.f32.mxu0 %vm171_vm0, %v1257_v2  ;;  %v1260_v5 = vld [vmem:[%s1441_s3 + $0x32] ss:$24 sps:$4 sm:$0xff]   ;;  %v1262_v7 = vld [vmem:[%s1441_s3 + $0x6] ss:$24 sps:$4 sm:$0xff]   ;;  %p1282_p3 = por %p1281_p2, %p1280_p1 }
  0x1b   : > { %1154 = vmatprep.mubr.msk.f32.mxu1 %vm171_vm0, %v1258_v3  ;;  %1148 = vmatmul.mubr.msk.f32.vlgmr.msra.gmra.mxu0 %vm171_vm0, %v1259_v4  ;;  %v1263_v8 = vld [vmem:[%s1441_s3 + $0x34] ss:$24 sps:$4 sm:$0xff]   ;;  %v1265_v10 = vld [vmem:[%s1441_s3 + $0x8] ss:$24 sps:$4 sm:$0xff]   ;;  %v1267_v12 = vld [vmem:[%s1441_s3 + $0x38] ss:$24 sps:$4 sm:$0xff]  }
  0x1c   : > { %1155 = vmatmul.mubr.msk.f32.vlgmr.msra.gmra.mxu1 %vm171_vm0, %v1260_v5  ;;  %1158 = vmatpush3.msra.mxu0 %v158_v0  ;;  %v1264_v9 = vld [vmem:[%s1441_s3 + $0x36] ss:$24 sps:$4 sm:$0xff]   ;;  %v1266_v11 = vld [vmem:[%s1441_s3 + $0xa] ss:$24 sps:$4 sm:$0xff]   ;;  %v1268_v13 = vld [vmem:[%s1441_s3 + $0x3a] ss:$24 sps:$4 sm:$0xff]   ;;  %p1283_p5 = pnand %p1282_p3, %p1276_p0 }
  0x1d   : > { %1165 = vmatpush3.msra.mxu1 %v158_v0  ;;  %1159 = vmatprep.subr.mxu0 %v1430_v1  ;;  %v1269_v14 = vld [vmem:[%s1441_s3 + $0xc] ss:$24 sps:$4 sm:$0xff]   ;;  %v1271_v16 = vld [vmem:[%s1441_s3 + $0x3c] ss:$24 sps:$4 sm:$0xff]  }
  0x1e   : > { %1166 = vmatprep.subr.mxu1 %v1430_v1  ;;  %1160 = vmatpush3.msra.mxu0 %v1430_v1  ;;  %v1270_v15 = vld [vmem:[%s1441_s3 + $0xe] ss:$24 sps:$4 sm:$0xff]   ;;  %v1272_v17 = vld [vmem:[%s1441_s3 + $0x3e] ss:$24 sps:$4 sm:$0xff]  }
  0x1f   : > { %1167 = vmatpush3.msra.mxu1 %v1430_v1  ;;  %1161 = vmatprep.mubr.msk.f32.mxu0 %vm171_vm0, %v1261_v6 }
  0x20   : > { %1168 = vmatprep.mubr.msk.f32.mxu1 %vm171_vm0, %v1262_v7  ;;  %1171 = vmatprep.subr.mxu0 %v158_v0 }
  0x21   : > { %1178 = vmatprep.subr.mxu1 %v158_v0  ;;  %1162 = vmatmul.mubr.msk.f32.vlgmr.msra.gmra.mxu0 %vm171_vm0, %v1263_v8 }
  0x22   : > { %1169 = vmatmul.mubr.msk.f32.vlgmr.msra.gmra.mxu1 %vm171_vm0, %v1264_v9  ;;  %1172 = vmatpush3.msra.mxu0 %v158_v0 }
  0x23   : > { %1179 = vmatpush3.msra.mxu1 %v158_v0  ;;  %1173 = vmatprep.subr.mxu0 %v1430_v1 }
  0x24   : > { %1180 = vmatprep.subr.mxu1 %v1430_v1  ;;  %1174 = vmatpush3.msra.mxu0 %v1430_v1 }
  0x25   : > { %1181 = vmatpush3.msra.mxu1 %v1430_v1  ;;  %1175 = vmatprep.mubr.msk.f32.mxu0 %vm171_vm0, %v1265_v10 }
  0x26   : > { %1182 = vmatprep.mubr.msk.f32.mxu1 %vm171_vm0, %v1266_v11  ;;  %1185 = vmatprep.subr.mxu0 %v158_v0 }
  0x27   : > { %1192 = vmatprep.subr.mxu1 %v158_v0  ;;  %1176 = vmatmul.mubr.msk.f32.vlgmr.msra.gmra.mxu0 %vm171_vm0, %v1267_v12 }
  0x28   : > { %1183 = vmatmul.mubr.msk.f32.vlgmr.msra.gmra.mxu1 %vm171_vm0, %v1268_v13  ;;  %1186 = vmatpush3.msra.mxu0 %v158_v0 }
  0x29   : > { %1193 = vmatpush3.msra.mxu1 %v158_v0  ;;  %1187 = vmatprep.subr.mxu0 %v1430_v1 }
  0x2a   : > { %1194 = vmatprep.subr.mxu1 %v1430_v1  ;;  %1188 = vmatpush3.msra.mxu0 %v1430_v1 }
  0x2b   : > { %1195 = vmatpush3.msra.mxu1 %v1430_v1  ;;  %1189 = vmatprep.mubr.msk.f32.mxu0 %vm171_vm0, %v1269_v14 }
  0x2c   : > { %1196 = vmatprep.mubr.msk.f32.mxu1 %vm171_vm0, %v1270_v15  ;;  %1190 = vmatmul.mubr.msk.f32.vlgmr.msra.gmra.mxu0 %vm171_vm0, %v1271_v16 }
  0x2d   : > { %1197 = vmatmul.mubr.msk.f32.vlgmr.msra.gmra.mxu1 %vm171_vm0, %v1272_v17 }
  0xdb   : > { %v1149_v18 = vpop.f32.mrf.mxu0 }
  0xdc   : > { %253 = vst.msk [vmem:[%s1490_s6 + $0x8] sm:$0xff] %vm251_vm1, %v1149_v18  ;;  %v1156_v19 = vpop.f32.mrf.mxu1 }
  0xdd   : > { %1056 = vst.msk [vmem:[%s1490_s6 + $0x18] sm:$0xff] %vm251_vm1, %v1156_v19  ;;  %v242_v20 = vpop.f32.mrf.mxu0 }
  0xde   : > { %252 = vst.msk [vmem:[%s1490_s6] sm:$0xff] %vm251_vm1, %v242_v20  ;;  %v338_v21 = vpop.f32.mrf.mxu1 }
  0xdf   : > { %1055 = vst.msk [vmem:[%s1490_s6 + $0x10] sm:$0xff] %vm251_vm1, %v338_v21 }
  0xe1   : > { %v1163_v22 = vpop.f32.mrf.mxu0 }
  0xe2   : > { %1064 = vst.msk [vmem:[%s1490_s6 + $0x28] sm:$0xff] %vm251_vm1, %v1163_v22  ;;  %v1170_v23 = vpop.f32.mrf.mxu1 }
  0xe3   : > { %1072 = vst.msk [vmem:[%s1490_s6 + $0x38] sm:$0xff] %vm251_vm1, %v1170_v23  ;;  %v433_v24 = vpop.f32.mrf.mxu0 }
  0xe4   : > { %1063 = vst.msk [vmem:[%s1490_s6 + $0x20] sm:$0xff] %vm251_vm1, %v433_v24  ;;  %v528_v25 = vpop.f32.mrf.mxu1 }
  0xe5   : > { %1071 = vst.msk [vmem:[%s1490_s6 + $0x30] sm:$0xff] %vm251_vm1, %v528_v25 }
  0xe7   : > { %v1177_v26 = vpop.f32.mrf.mxu0 }
  0xe8   : > { %1080 = vst.msk [vmem:[%s1490_s6 + $0x48] sm:$0xff] %vm251_vm1, %v1177_v26  ;;  %v1184_v27 = vpop.f32.mrf.mxu1 }
  0xe9   : > { %1088 = vst.msk [vmem:[%s1490_s6 + $0x58] sm:$0xff] %vm251_vm1, %v1184_v27  ;;  %v623_v28 = vpop.f32.mrf.mxu0 }
  0xea   : > { %1079 = vst.msk [vmem:[%s1490_s6 + $0x40] sm:$0xff] %vm251_vm1, %v623_v28  ;;  %v718_v29 = vpop.f32.mrf.mxu1 }
  0xeb   : > { %1087 = vst.msk [vmem:[%s1490_s6 + $0x50] sm:$0xff] %vm251_vm1, %v718_v29 }
  0xec   : > { %v1191_v30 = vpop.f32.mrf.mxu0 }
  0xed   : > { %1096 = vst.msk [vmem:[%s1490_s6 + $0x68] sm:$0xff] %vm251_vm1, %v1191_v30  ;;  %v1198_v31 = vpop.f32.mrf.mxu1 }
  0xee   : > { %1104 = vst.msk [vmem:[%s1490_s6 + $0x78] sm:$0xff] %vm251_vm1, %v1198_v31  ;;  %v813_v32 = vpop.f32.mrf.mxu0 }
  0xef   : > { %1095 = vst.msk [vmem:[%s1490_s6 + $0x60] sm:$0xff] %vm251_vm1, %v813_v32  ;;  %v908_v33 = vpop.f32.mrf.mxu1 }
  0xf0   : > { %1103 = vst.msk [vmem:[%s1490_s6 + $0x70] sm:$0xff] %vm251_vm1, %v908_v33 }
  0xf1   : > { %1286 = shalt.err (!%p1283_p5)
}
  0xf2   : > { %s1287_s26 = scalar_lea.hbm %s1523_s18, 2048  ;;  %s1291_s29 = scalar_lea.hbm %s1582_s2, 4096 }
  0xf3   : > { %p1288_p6 = scmp.ne.s32.totalorder %s1523_s18, %s1287_s26  ;;  %p1292_p10 = scmp.lt.s32.totalorder %s1523_s18, %s1582_s2 }
  0xf4   : > { %p1293_p11 = scmp.lt.s32.totalorder %s1291_s29, %s1287_s26 }
  0xf5   : > { %p1289_p7 = pnand %p1288_p6, %p1409_p4 }
  0xf6   : > { %p1294_p12 = por %p1293_p11, %p1292_p10 }
  0xf7   : > { %p1290_p9 = pneg %p1289_p7 }
  0xf9   : > { %p1295_p13 = pnand %p1294_p12, %p1290_p9 }
  0xfb   : > { %1298 = shalt.err (!%p1295_p13)
}
  0xfc   : > { %s1352_s4 = smov 128   ;;  %s1353_s5 = smov 8  }
  0xfd   : > { %1200 = dma.vmem_to_hbm [thread:$0]  (%p1409_p4), %s1525_s8, 2048, %s1523_s18, %s1535_s12, %s1352_s4, %s1352_s4, %s1353_s5  }
  0xfe PF: > { %p1206_p0 = scmp.ge.s32.totalorder %s1349_s14, 2  ;;  %s952_s6 = sand.u32 1, %s1329_s9  }
  0xff   : > { %s953_s7 = scalar_lea.sflag [#allocation3], %s952_s6 }
 0x100   : > { %p1203_p1 = pnand %p1206_p0, %p1416_p8 }
 0x102   : > { %p1204_p2 = pneg %p1203_p1 }
 0x104   : > { %1324 = dma.done.wait (%p1204_p2), %s953_s7, 2048  }
 0x105   : > { %1326 = vsyncadd (%p1204_p2), %s953_s7, 4294965248  ;;  %s15_s14 = sadd.s32 1, %s1349_s14   ;;  %s1585_s9 = smov %s1333_s10 }
 0x106   : > { %p12_p3 = scmp.ge.s32.totalorder %s15_s14, 4   ;;  %s1586_s10 = smov %s1337_s11 }
 0x107   : > { %s1587_s11 = smov %s1422_s22  ;;  %s1588_s12 = smov %s1345_s13 }
 0x108   : > { %s1589_s13 = smov %s1591_s17  ;;  %14 = sbr.rel (!%p12_p3) target bundleno = 4 (0x4), region = 78 }
 0x10d   :  { %958 = vsyncpa [#allocation3], 1 }
 0x10e   :  { %960 = vsyncpa [#allocation3 + $0x1], 1 }

</bundles_post_ra>
